<compile_context>
chip_gen: v5e
topology: v5e:2x2
jax: 0.10.0
libtpu: 0.0.40
codegen_flags: <defaults>
</compile_context>

<pallas_src>
from functools import partial

import jax
import jax.numpy as jnp
import numpy as np
from jax import lax
from jax.experimental import pallas as pl
from jax.experimental.pallas import tpu as pltpu


def _round_up(x, m):
    return ((x + m - 1) // m) * m


def _conv_relu_nhwc(x_nhwc, w_oihw, bias, padding):
    """Core: NHWC input (raw Cin), returns channel-padded NHWC bf16 output."""
    N, H, W, Cin = x_nhwc.shape
    Cout, _, KH, KW = w_oihw.shape
    Coutp = _round_up(Cout, 128)
    K_all = KH * KW * Cin                       # im2col contraction depth

    Hp, Wp = H + 2 * padding, W + 2 * padding
    Ho, Wo = Hp - KH + 1, Wp - KW + 1

    # --- Row tiling with halo -------------------------------------------------
    # ~32 output rows per tile keeps blocks at a few 100 KB (safe on v7x's
    # 64 MiB VMEM) and yields >=2 parallel grid units even for N == 1.
    tile_h = min(32, Ho)
    n_tiles = -(-Ho // tile_h)
    Ho_pad = n_tiles * tile_h
    TH2 = tile_h + KH - 1                       # rows per slab incl. halo

    # Spatial zero-pad (+ bottom pad so the last row tile is full) in bf16.
    xp = jnp.pad(x_nhwc.astype(jnp.bfloat16),
                 ((0, 0),
                  (padding, padding + (Ho_pad - Ho)),
                  (padding, padding),
                  (0, 0)))
    # Non-overlapping halo'd slabs: slab g holds rows [g*tile_h, g*tile_h+TH2).
    xg = jnp.stack([xp[:, g * tile_h: g * tile_h + TH2] for g in range(n_tiles)],
                   axis=1)                      # (N, n_tiles, TH2, Wp, Cin)

    # Weight as one im2col matrix; row order (kh, kw, c) matches the in-kernel
    # patch build. Bias stays f32 (seeds the f32 accumulator path).
    w2d = jnp.transpose(w_oihw, (2, 3, 1, 0)).reshape(K_all, Cout)
    w2d = jnp.pad(w2d, ((0, 0), (0, Coutp - Cout))).astype(jnp.bfloat16)
    b2d = jnp.pad(bias.astype(jnp.float32), (0, Coutp - Cout)).reshape(1, Coutp)

    M = tile_h * Wo                             # output pixels per tile

    def kernel(x_ref, w_ref, b_ref, o_ref):
        # x_ref: (1, 1, TH2, Wp, Cin) bf16 (raw, unpadded channels)
        # w_ref: (K_all, Coutp) bf16 ; b_ref: (1, Coutp) f32
        # o_ref: (1, 1, M, Coutp) bf16 (lane-dense)
        x = x_ref[0, 0]                         # (TH2, Wp, Cin)
        # im2col patch: KH*KW small raw-Cin slices, one concat, ONE matmul.
        taps = [x[kh:kh + tile_h, kw:kw + Wo, :]
                for kh in range(KH) for kw in range(KW)]
        patch = jnp.concatenate(taps, axis=-1).reshape(M, K_all)
        acc = jnp.dot(patch, w_ref[...], preferred_element_type=jnp.float32)
        acc = acc + b_ref[...]                  # f32 bias broadcast
        o_ref[...] = jnp.maximum(acc, 0.0).astype(o_ref.dtype)[None, None]

    # VMEM budget from actual block bytes (double-buffered) + live temporaries
    # + resident constants + margin (instead of a fixed fraction of capacity).
    in_blk = TH2 * Wp * Cin * 2                 # bf16 input slab
    out_blk = M * Coutp * 2                     # bf16 output block
    live = M * (K_all * 2 + Coutp * 4)          # patch (bf16) + acc (f32)
    const = K_all * Coutp * 2 + Coutp * 4       # weights + bias
    vmem_limit = min(2 * (in_blk + out_blk) + live + const + (8 << 20), 48 << 20)

    out = pl.pallas_call(
        kernel,
        out_shape=jax.ShapeDtypeStruct((N, n_tiles, M, Coutp), jnp.bfloat16),
        grid=(N, n_tiles),
        in_specs=[
            pl.BlockSpec((1, 1, TH2, Wp, Cin), lambda n, r: (n, r, 0, 0, 0)),
            pl.BlockSpec((K_all, Coutp), lambda n, r: (0, 0)),
            pl.BlockSpec((1, Coutp), lambda n, r: (0, 0)),
        ],
        out_specs=pl.BlockSpec((1, 1, M, Coutp), lambda n, r: (n, r, 0, 0)),
        compiler_params=pltpu.CompilerParams(
            dimension_semantics=("parallel", "parallel"),
            vmem_limit_bytes=vmem_limit),
    )(xg, w2d, b2d)

    # (N, n_tiles, M, Coutp) -> (N, Ho, Wo, Coutp); drop the bottom pad rows.
    return out.reshape(N, Ho_pad, Wo, Coutp)[:, :Ho]


@partial(jax.jit, static_argnums=(3,))
def basic_block_forward(x_nchw, w_oihw, bias, padding):
    """BasicBlock.forward: Conv2d(..., padding=padding) + ReLU on NCHW."""
    Cout = w_oihw.shape[0]
    x_nhwc = jnp.transpose(x_nchw, (0, 2, 3, 1))
    y = _conv_relu_nhwc(x_nhwc, w_oihw, bias, padding)
    # TODO(synk): chained BasicBlocks should consume the NHWC bf16 output of
    # _conv_relu_nhwc directly; NCHW<->NHWC/dtype glue belongs only at the
    # network boundary.
    y = y[..., :Cout]
    return jnp.transpose(y, (0, 3, 1, 2)).astype(x_nchw.dtype)


def reference_forward(x_nchw, w_oihw, bias, padding):
    y = lax.conv_general_dilated(
        x_nchw, w_oihw,
        window_strides=(1, 1),
        padding=[(padding, padding), (padding, padding)],
        dimension_numbers=("NCHW", "OIHW", "NCHW"))
    y = y + bias.reshape(1, -1, 1, 1)
    return jnp.maximum(y, 0.0)


if __name__ == "__main__":
    # Small deterministic config consistent with BasicBlock(in, out, k, padding)
    N, Cin, H, W = 2, 4, 16, 16
    Cout, K, padding = 8, 3, 1

    key = jax.random.PRNGKey(0)
    kx, kw, kb = jax.random.split(key, 3)

    x = jax.random.normal(kx, (N, Cin, H, W), dtype=jnp.float32)

    # PyTorch-style default init: U(-bound, bound), bound = 1/sqrt(fan_in)
    fan_in = Cin * K * K
    bound = 1.0 / np.sqrt(fan_in)
    w = jax.random.uniform(kw, (Cout, Cin, K, K), jnp.float32, -bound, bound)
    b = jax.random.uniform(kb, (Cout,), jnp.float32, -bound, bound)

    out = jax.block_until_ready(basic_block_forward(x, w, b, padding))
    ref = jax.block_until_ready(reference_forward(x, w, b, padding))

    # bf16 operands (f32 accumulation) -> loosened tolerance vs f32 reference.
    np.testing.assert_allclose(np.asarray(out), np.asarray(ref),
                               rtol=2e-2, atol=2e-2)
    print("KERNEL_OK")
</pallas_src>

<mosaic_0001>
module attributes {stable_mosaic.version = 11 : i64} {
  func.func @kernel(%arg0: i32, %arg1: i32, %arg2: memref<1x1x18x18x4xbf16, #tpu.memory_space<vmem>>, %arg3: memref<36x128xbf16, #tpu.memory_space<vmem>>, %arg4: memref<1x128xf32, #tpu.memory_space<vmem>>, %arg5: memref<1x1x256x128xbf16, #tpu.memory_space<vmem>>) attributes {dimension_semantics = [#tpu.dimension_semantics<parallel>, #tpu.dimension_semantics<parallel>], iteration_bounds = array<i64: 2, 1>, scalar_prefetch = 0 : i64, scratch_operands = 0 : i64, tpu.core_type = #tpu.core_type<tc>, window_params = [{transform_indices = @transform_0, window_bounds = array<i64: 1, 1, 18, 18, 4>}, {pipeline_mode = #tpu.pipeline_mode<synchronous>, transform_indices = @transform_1, window_bounds = array<i64: 36, 128>}, {pipeline_mode = #tpu.pipeline_mode<synchronous>, transform_indices = @transform_2, window_bounds = array<i64: 1, 128>}, {transform_indices = @transform_3, window_bounds = array<i64: 1, 1, 256, 128>}]} {
    %c0 = arith.constant 0 : index
    %c0_0 = arith.constant 0 : index
    %c0_1 = arith.constant 0 : index
    %c0_2 = arith.constant 0 : index
    %c0_3 = arith.constant 0 : index
    %0 = vector.load %arg2[%c0, %c0_0, %c0_1, %c0_2, %c0_3] : memref<1x1x18x18x4xbf16, #tpu.memory_space<vmem>>, vector<1x1x18x18x4xbf16>
    %1 = vector.shape_cast %0 : vector<1x1x18x18x4xbf16> to vector<18x18x4xbf16>
    %2 = vector.extract_strided_slice %1 {offsets = [0, 0, 0], sizes = [16, 16, 4], strides = [1, 1, 1]} : vector<18x18x4xbf16> to vector<16x16x4xbf16>
    %3 = vector.extract_strided_slice %1 {offsets = [0, 1, 0], sizes = [16, 16, 4], strides = [1, 1, 1]} : vector<18x18x4xbf16> to vector<16x16x4xbf16>
    %4 = vector.extract_strided_slice %1 {offsets = [0, 2, 0], sizes = [16, 16, 4], strides = [1, 1, 1]} : vector<18x18x4xbf16> to vector<16x16x4xbf16>
    %5 = vector.extract_strided_slice %1 {offsets = [1, 0, 0], sizes = [16, 16, 4], strides = [1, 1, 1]} : vector<18x18x4xbf16> to vector<16x16x4xbf16>
    %6 = vector.extract_strided_slice %1 {offsets = [1, 1, 0], sizes = [16, 16, 4], strides = [1, 1, 1]} : vector<18x18x4xbf16> to vector<16x16x4xbf16>
    %7 = vector.extract_strided_slice %1 {offsets = [1, 2, 0], sizes = [16, 16, 4], strides = [1, 1, 1]} : vector<18x18x4xbf16> to vector<16x16x4xbf16>
    %8 = vector.extract_strided_slice %1 {offsets = [2, 0, 0], sizes = [16, 16, 4], strides = [1, 1, 1]} : vector<18x18x4xbf16> to vector<16x16x4xbf16>
    %9 = vector.extract_strided_slice %1 {offsets = [2, 1, 0], sizes = [16, 16, 4], strides = [1, 1, 1]} : vector<18x18x4xbf16> to vector<16x16x4xbf16>
    %10 = vector.extract_strided_slice %1 {offsets = [2, 2, 0], sizes = [16, 16, 4], strides = [1, 1, 1]} : vector<18x18x4xbf16> to vector<16x16x4xbf16>
    %11 = tpu.concatenate %2, %3, %4, %5, %6, %7, %8, %9, %10 in 2 : vector<16x16x4xbf16>, vector<16x16x4xbf16>, vector<16x16x4xbf16>, vector<16x16x4xbf16>, vector<16x16x4xbf16>, vector<16x16x4xbf16>, vector<16x16x4xbf16>, vector<16x16x4xbf16>, vector<16x16x4xbf16> -> vector<16x16x36xbf16>
    %12 = vector.shape_cast %11 : vector<16x16x36xbf16> to vector<256x36xbf16>
    %c0_4 = arith.constant 0 : index
    %c0_5 = arith.constant 0 : index
    %13 = vector.load %arg3[%c0_4, %c0_5] : memref<36x128xbf16, #tpu.memory_space<vmem>>, vector<36x128xbf16>
    %cst = arith.constant dense<0.000000e+00> : vector<256x128xf32>
    %14 = tpu.matmul %12, %13, %cst {dimension_numbers = #tpu.dot_dimension_numbers<[1], [0], [0], [1], [0, 0, 1, 1], [], []>} : vector<256x36xbf16>, vector<36x128xbf16>, vector<256x128xf32> -> vector<256x128xf32>
    %c0_6 = arith.constant 0 : index
    %c0_7 = arith.constant 0 : index
    %15 = vector.load %arg4[%c0_6, %c0_7] : memref<1x128xf32, #tpu.memory_space<vmem>>, vector<1x128xf32>
    %16 = vector.broadcast %15 : vector<1x128xf32> to vector<256x128xf32>
    %17 = arith.addf %14, %16 : vector<256x128xf32>
    %cst_8 = arith.constant 0.000000e+00 : f32
    %18 = vector.broadcast %cst_8 : f32 to vector<256x128xf32>
    %19 = arith.maximumf %17, %18 : vector<256x128xf32>
    %20 = arith.truncf %19 : vector<256x128xf32> to vector<256x128xbf16>
    %21 = vector.shape_cast %20 : vector<256x128xbf16> to vector<1x1x256x128xbf16>
    %c0_9 = arith.constant 0 : index
    %c0_10 = arith.constant 0 : index
    %c0_11 = arith.constant 0 : index
    %c0_12 = arith.constant 0 : index
    %22 = vector.load %arg5[%c0_9, %c0_10, %c0_11, %c0_12] : memref<1x1x256x128xbf16, #tpu.memory_space<vmem>>, vector<1x1x256x128xbf16>
    tpu.vector_store %arg5[%c0_9, %c0_10, %c0_11, %c0_12], %21 {strides = array<i32>} : memref<1x1x256x128xbf16, #tpu.memory_space<vmem>>, vector<1x1x256x128xbf16>,
    return
  }
  func.func @transform_0(%arg0: i32, %arg1: i32) -> (i32, i32, i32, i32, i32) {
    %c0_i32 = arith.constant 0 : i32
    %c0_i32_0 = arith.constant 0 : i32
    %c0_i32_1 = arith.constant 0 : i32
    %c0_i32_2 = arith.constant 0 : i32
    return %arg0, %arg1, %c0_i32, %c0_i32_0, %c0_i32_1 : i32, i32, i32, i32, i32
  }
  func.func @transform_1(%arg0: i32, %arg1: i32) -> (i32, i32) {
    %c0_i32 = arith.constant 0 : i32
    %c0_i32_0 = arith.constant 0 : i32
    %c0_i32_1 = arith.constant 0 : i32
    return %c0_i32, %c0_i32_0 : i32, i32
  }
  func.func @transform_2(%arg0: i32, %arg1: i32) -> (i32, i32) {
    %c0_i32 = arith.constant 0 : i32
    %c0_i32_0 = arith.constant 0 : i32
    %c0_i32_1 = arith.constant 0 : i32
    return %c0_i32, %c0_i32_0 : i32, i32
  }
  func.func @transform_3(%arg0: i32, %arg1: i32) -> (i32, i32, i32, i32) {
    %c0_i32 = arith.constant 0 : i32
    %c0_i32_0 = arith.constant 0 : i32
    %c0_i32_1 = arith.constant 0 : i32
    return %arg0, %arg1, %c0_i32, %c0_i32_0 : i32, i32, i32, i32
  }
}

</mosaic_0001>

<bundles_post_ra>
// kernel: basic_block_forward.1
= control target key start
LH: loop header
LB: loop body
LE: loop exit
PB: predicated region body
PF: predicated region fallthrough
CT: control target
= control target key end

     0   :  { %s1854_s12 = smov 0   ;;  %s1856_s13 = smov 0   ;;  %s2730_s0 = inlined_call_operand.vmem [shape: bf16[2,1,18,18,4], index: 0, kind: input, shape index: {}]   ;;  %s2731_s1 = inlined_call_operand.vmem [shape: bf16[36,128], index: 1, kind: input, shape index: {}]   ;;  %s2732_s2 = inlined_call_operand.vmem [shape: f32[1,128], index: 2, kind: input, shape index: {}]   ;;  %s2733_s3 = inlined_call_operand.vmem [shape: bf16[2,1,256,128], index: 3, kind: output, shape index: {}]  }
   0x1   :  { %s1858_s14 = smov 0  }
   0x2 LB: > { %s25_s15 = sadd.s32 1, %s1820_s13  ;;  %p1540_p0 = scmp.ge.s32.totalorder %s1824_s14, 1  ;;  %s1824_s14 = sphi %s1858_s14, %s13_s14   ;;  %s1820_s13 = sphi %s1856_s13, %s2747_s13   ;;  %s1816_s12 = sphi %s1854_s12, %s2746_s12  }
   0x3   : > { %p27_p1 = scmp.ge.s32.totalorder %s25_s15, 2  ;;  %p157_p2 = scmp.lt.s32.totalorder %s1824_s14, 3 }
   0x5   : > { %s2749_s15 = smov (%p27_p1, %s25_s15), 0  ;;  %p158_p3 = pnand %p1540_p0, %p157_p2 }
   0x7   : > { %161 = sbr.rel (%p158_p3) target bundleno = 622 (0x26e), region = 32 }
   0xc   : > { %p189_p4 = scmp.lt.s32.totalorder %s1816_s12, 1  ;;  %vm390_vm0 = vsmask.f32 7424  ;;  %s1826_s20 = smov 4   ;;  %vm615_vm1 = vcmask 1046528   ;;  %vm967_vm2 = vcmask 64512  }
   0xd   : > { %s1827_s21 = smov 8   ;;  %s1828_s22 = smov 12   ;;  %vm934_vm3 = vcmask 31744   ;;  %vm1000_vm4 = vcmask 97280   ;;  %vm1255_vm5 = vcmask 1041408   ;;  %vm1033_vm6 = vcmask 130048  }
   0xe   : > { %s2751_s12 = smov (!%p189_p4, %s1816_s12), 1  ;;  %s1829_s23 = smov 16   ;;  %vm1066_vm7 = vcmask 162816   ;;  %vm1099_vm8 = vcmask 195584   ;;  %vm1132_vm9 = vcmask 228352   ;;  %vm1165_vm10 = vcmask 261120  }
   0xf   : > { %s1767_s16 = smul.u32 216, %s2751_s12  ;;  %s1830_s24 = smov 24   ;;  %vm1222_vm11 = vcmask 293888  }
  0x10   : > { %s1831_s25 = smov 20   ;;  %s1832_s26 = smov 28  }
  0x11   : > { %s1878_s19 = scalar_lea.vmem %s2730_s0, %s1767_s16  ;;  %s1833_s27 = smov 32  }
  0x12   : > { %v1881_v0 = vld [vmem:[%s1878_s19 + $0x30] sm:$0xff]  ;;  %v222_v1 = vld [vmem:[%s1878_s19 + $0x38] sm:$0x1]  ;;  %v216_v4 = vld [vmem:[%s1878_s19 + $0x20] sm:$0x1]  ;;  %s1642_s9 = sshll.u32 %s2751_s12, 7 }
  0x13   : > { %v1885_v2 = vld [vmem:[%s1878_s19 + $0x18] sm:$0xff]  ;;  %v362_v3 = vunpack.c.l.b16 %v222_v1  ;;  %v1889_v5 = vld [vmem:[%s1878_s19] sm:$0xff]  ;;  %v210_v6 = vld [vmem:[%s1878_s19 + $0x8] sm:$0x1]  ;;  %v440_v7 = vshrl.u32 %v1881_v0, 16  ;;  %v442_v8 = vshll.u32 %v1881_v0, 16  ;;  %v360_v9 = vunpack.c.l.b16 %v216_v4  ;;  %s2647_s16 = scalar_lea.vmem %s2733_s3, %s1642_s9 }
  0x14   : > { %v416_v10 = vshrl.u32 %v1885_v2, 16  ;;  %v225_v11 = vld [vmem:[%s1878_s19 + $0x44] sm:$0x1]  ;;  %v418_v13 = vshll.u32 %v1885_v2, 16  ;;  %v358_v14 = vunpack.c.l.b16 %v210_v6  ;;  %v392_v15 = vshrl.u32 %v1889_v5, 16  ;;  %v1901_v16 = vld [vmem:[%s1878_s19 + $0x3c] sm:$0xff] }
  0x15   : > { %v1896_v12 = vpack.c.b16 %v362_v3, %v362_v3  ;;  %v444_v17 = vrot.slane %v442_v8, 1  ;;  %v1903_v18 = vpack.c.b16 %v360_v9, %v360_v9  ;;  %v394_v19 = vshll.u32 %v1889_v5, 16  ;;  %v219_v25 = vld [vmem:[%s1878_s19 + $0x2c] sm:$0x1]  ;;  %v1915_v30 = vld [vmem:[%s1878_s19 + $0x24] sm:$0xff]  ;;  %v1948_v59 = vld [vmem:[%s1878_s19 + $0x54] sm:$0xff] }
  0x16   : > { %v363_v20 = vunpack.c.l.b16 %v225_v11  ;;  %v420_v22 = vrot.slane %v418_v13, 1  ;;  %v1907_v23 = vpack.c.b16 %v358_v14, %v358_v14  ;;  %v452_v24 = vshrl.u32 %v1901_v16, 16  ;;  %v1921_v39 = vld [vmem:[%s1878_s19 + $0xc] sm:$0xff]  ;;  %v213_v40 = vld [vmem:[%s1878_s19 + $0x14] sm:$0x1]  ;;  %v1929_v45 = vld [vmem:[%s1878_s19 + $0x60] sm:$0xff] }
  0x17   : > { %v447_v21 = vshll.u32 %v1896_v12, 16  ;;  %v445_v26 = vor.u32 %v444_v17, %v440_v7  ;;  %v423_v27 = vshll.u32 %v1903_v18, 16  ;;  %v396_v28 = vrot.slane %v394_v19, 1  ;;  %v234_v46 = vld [vmem:[%s1878_s19 + $0x68] sm:$0x1] }
  0x18   : > { %v1912_v29 = vpack.c.b16 %v363_v20, %v363_v20  ;;  %v421_v32 = vor.u32 %v420_v22, %v416_v10  ;;  %v399_v33 = vshll.u32 %v1907_v23, 16  ;;  %v454_v34 = vshll.u32 %v1901_v16, 16  ;;  %v231_v60 = vld [vmem:[%s1878_s19 + $0x5c] sm:$0x1]  ;;  %v1961_v8 = vld [vmem:[%s1878_s19 + $0x48] sm:$0xff] }
  0x19   : > { %v449_v31 = vrot.slane %v447_v21, 1  ;;  %v425_v35 = vrot.slane %v423_v27, 1  ;;  %v397_v36 = vor.u32 %v396_v28, %v392_v15  ;;  %v361_v38 = vunpack.c.l.b16 %v219_v25  ;;  %v228_v9 = vld [vmem:[%s1878_s19 + $0x50] sm:$0x1]  ;;  %v243_v21 = vld [vmem:[%s1878_s19 + $0x8c] sm:$0x1] }
  0x1a   : > { %v459_v37 = vshll.u32 %v1912_v29, 16  ;;  %v401_v42 = vrot.slane %v399_v33, 1  ;;  %v456_v43 = vrot.slane %v454_v34, 1  ;;  %v428_v44 = vshrl.u32 %v1915_v30, 16  ;;  %v1975_v27 = vld [vmem:[%s1878_s19 + $0x84] sm:$0xff]  ;;  %v1982_v34 = vld [vmem:[%s1878_s19 + $0x78] sm:$0xff] }
  0x1b   : > { %v1925_v41 = vsel %vm390_vm0, %v445_v26, %v449_v31  ;;  %v1935_v47 = vsel %vm390_vm0, %v421_v32, %v425_v35  ;;  %v1937_v49 = vpack.c.b16 %v361_v38, %v361_v38  ;;  %v430_v50 = vshll.u32 %v1915_v30, 16 }
  0x1c   : > { %591 = vrot.lane.b32.xlu2 %v1925_v41, %s1826_s20  ;;  %v461_v48 = vrot.slane %v459_v37, 1  ;;  %587 = vrot.lane.b32.xlu1 %v1935_v47, %s1826_s20  ;;  %v402_v51 = vsel %vm390_vm0, %v397_v36, %v401_v42  ;;  %v457_v52 = vor.u32 %v456_v43, %v452_v24  ;;  %v359_v53 = vunpack.c.l.b16 %v213_v40  ;;  %v240_v40 = vld [vmem:[%s1878_s19 + $0x80] sm:$0x1] }
  0x1d   : > { %v404_v54 = vshrl.u32 %v1921_v39, 16  ;;  %583 = vrot.lane.b32.xlu0 %v402_v51, %s1826_s20  ;;  %v432_v55 = vrot.slane %v430_v50, 1  ;;  %v435_v56 = vshll.u32 %v1937_v49, 16  ;;  %v406_v57 = vshll.u32 %v1921_v39, 16 }
  0x1e   : > { %v366_v58 = vunpack.c.l.b16 %v234_v46  ;;  %v1952_v61 = vsel %vm390_vm0, %v457_v52, %v461_v48  ;;  %v1954_v62 = vpack.c.b16 %v359_v53, %v359_v53  ;;  %v488_v63 = vshrl.u32 %v1929_v45, 16  ;;  %v2001_v52 = vld [vmem:[%s1878_s19 + $0x6c] sm:$0xff]  ;;  %v237_v53 = vld [vmem:[%s1878_s19 + $0x74] sm:$0x1] }
  0x1f   : > { %2738 = vst [vmem:[#allocation2_spill] sm:$0xff] %v1952_v61  ;;  %v490_v1 = vshll.u32 %v1929_v45, 16  ;;  %v433_v3 = vor.u32 %v432_v55, %v428_v44  ;;  %v437_v4 = vrot.slane %v435_v56, 1  ;;  %v408_v6 = vrot.slane %v406_v57, 1 }
  0x20   : > { %v1958_v7 = vpack.c.b16 %v366_v58, %v366_v58  ;;  %v411_v10 = vshll.u32 %v1954_v62, 16  ;;  %v365_v13 = vunpack.c.l.b16 %v231_v60  ;;  %v476_v14 = vshrl.u32 %v1948_v59, 16  ;;  %v2009_v58 = vld [vmem:[%s1878_s19 + $0xa8] sm:$0xff] }
  0x21   : > { %v492_v11 = vrot.slane %v490_v1, 1  ;;  %v1967_v15 = vsel %vm390_vm0, %v433_v3, %v437_v4  ;;  %v409_v17 = vor.u32 %v408_v6, %v404_v54  ;;  %v478_v20 = vshll.u32 %v1948_v59, 16  ;;  %v252_v4 = vld [vmem:[%s1878_s19 + $0xb0] sm:$0x1] }
  0x22   : > { %v495_v19 = vshll.u32 %v1958_v7, 16  ;;  %v413_v22 = vrot.slane %v411_v10, 1  ;;  %v1972_v25 = vpack.c.b16 %v365_v13, %v365_v13  ;;  %v364_v26 = vunpack.c.l.b16 %v228_v9 }
  0x23   : > { %v493_v24 = vor.u32 %v492_v11, %v488_v63  ;;  %v480_v31 = vrot.slane %v478_v20, 1  ;;  %v464_v32 = vshrl.u32 %v1961_v8, 16  ;;  %v466_v33 = vshll.u32 %v1961_v8, 16  ;;  %v2025_v20 = vld [vmem:[%s1878_s19 + $0x9c] sm:$0xff] }
  0x24   : > { %593 = vrot.lane.b32.xlu2 %v1952_v61, %s1826_s20  ;;  %v497_v28 = vrot.slane %v495_v19, 1  ;;  %589 = vrot.lane.b32.xlu1 %v1967_v15, %s1826_s20  ;;  %v1987_v35 = vsel %vm390_vm0, %v409_v17, %v413_v22  ;;  %v483_v36 = vshll.u32 %v1972_v25, 16  ;;  %v1990_v37 = vpack.c.b16 %v364_v26, %v364_v26 }
  0x25   : > { %v369_v38 = vunpack.c.l.b16 %v243_v21  ;;  %585 = vrot.lane.b32.xlu0 %v1987_v35, %s1826_s20  ;;  %v481_v42 = vor.u32 %v480_v31, %v476_v14  ;;  %v468_v43 = vrot.slane %v466_v33, 1  ;;  %v524_v44 = vshrl.u32 %v1975_v27, 16  ;;  %v249_v21 = vld [vmem:[%s1878_s19 + $0xa4] sm:$0x1] }
  0x26   : > { %v485_v46 = vrot.slane %v483_v36, 1  ;;  %v471_v48 = vshll.u32 %v1990_v37, 16  ;;  %v526_v51 = vshll.u32 %v1975_v27, 16  ;;  %v2005_v54 = vsel %vm390_vm0, %v493_v24, %v497_v28 }
  0x27   : > { %v1997_v50 = vpack.c.b16 %v369_v38, %v369_v38  ;;  %v469_v55 = vor.u32 %v468_v43, %v464_v32  ;;  %v368_v56 = vunpack.c.l.b16 %v240_v40  ;;  %v514_v57 = vshll.u32 %v1982_v34, 16  ;;  %v2042_v43 = vld [vmem:[%s1878_s19 + $0x90] sm:$0xff] }
  0x28   : > { %v473_v60 = vrot.slane %v471_v48, 1  ;;  %v528_v63 = vrot.slane %v526_v51, 1  ;;  %v512_v3 = vshrl.u32 %v1982_v34, 16  ;;  %v2015_v6 = vsel %vm390_vm0, %v481_v42, %v485_v46 }
  0x29   : > { %v531_v1 = vshll.u32 %v1997_v50, 16  ;;  %v2017_v9 = vpack.c.b16 %v368_v56, %v368_v56  ;;  %v516_v10 = vrot.slane %v514_v57, 1  ;;  %v367_v11 = vunpack.c.l.b16 %v237_v53 }
  0x2a   : > { %v2020_v13 = vsel %vm390_vm0, %v469_v55, %v473_v60  ;;  %v529_v14 = vor.u32 %v528_v63, %v524_v44  ;;  %v500_v17 = vshrl.u32 %v2001_v52, 16  ;;  %v502_v19 = vshll.u32 %v2001_v52, 16  ;;  %v246_v44 = vld [vmem:[%s1878_s19 + $0x98] sm:$0x1] }
  0x2b   : > { %v533_v22 = vrot.slane %v531_v1, 1  ;;  %v519_v24 = vshll.u32 %v2017_v9, 16  ;;  %v2031_v26 = vpack.c.b16 %v367_v11, %v367_v11  ;;  %v372_v28 = vunpack.c.l.b16 %v252_v4 }
  0x2c   : > { %599 = vrot.lane.b32.xlu2 %v2005_v54, %s1826_s20  ;;  %597 = vrot.lane.b32.xlu1 %v2015_v6, %s1826_s20  ;;  %v517_v31 = vor.u32 %v516_v10, %v512_v3  ;;  %v504_v32 = vrot.slane %v502_v19, 1  ;;  %v562_v33 = vshll.u32 %v2009_v58, 16  ;;  %v371_v42 = vunpack.c.l.b16 %v249_v21 }
  0x2d   : > { %595 = vrot.lane.b32.xlu0 %v2020_v13, %s1826_s20  ;;  %v521_v36 = vrot.slane %v519_v24, 1  ;;  %v507_v38 = vshll.u32 %v2031_v26, 16  ;;  %v2039_v40 = vpack.c.b16 %v372_v28, %v372_v28  ;;  %v550_v48 = vshll.u32 %v2025_v20, 16 }
  0x2e   : > { %v505_v46 = vor.u32 %v504_v32, %v500_v17  ;;  %v2047_v51 = vsel %vm390_vm0, %v529_v14, %v533_v22  ;;  %v560_v55 = vshrl.u32 %v2009_v58, 16  ;;  %v2050_v56 = vpack.c.b16 %v371_v42, %v371_v42  ;;  %v255_v14 = vld [vmem:[%s1878_s19 + $0xbc] sm:$0x1]  ;;  %v2067_v22 = vld [vmem:[%s1878_s19 + $0xb4] sm:$0xff] }
  0x2f   : > { %v509_v53 = vrot.slane %v507_v38, 1  ;;  %v564_v57 = vrot.slane %v562_v33, 1  ;;  %v567_v60 = vshll.u32 %v2039_v40, 16  ;;  %v548_v63 = vshrl.u32 %v2025_v20, 16 }
  0x30   : > { %v370_v1 = vunpack.c.l.b16 %v246_v44  ;;  %v2055_v3 = vsel %vm390_vm0, %v517_v31, %v521_v36  ;;  %v552_v4 = vrot.slane %v550_v48, 1  ;;  %v555_v10 = vshll.u32 %v2050_v56, 16 }
  0x31   : > { %v538_v11 = vshll.u32 %v2042_v43, 16  ;;  %v2061_v17 = vsel %vm390_vm0, %v505_v46, %v509_v53  ;;  %v536_v21 = vshrl.u32 %v2042_v43, 16  ;;  %v565_v28 = vor.u32 %v564_v57, %v560_v55 }
  0x32   : > { %2739 = vst [vmem:[#allocation3_spill] sm:$0xff] %v2061_v17  ;;  %v2063_v19 = vpack.c.b16 %v370_v1, %v370_v1  ;;  %v569_v31 = vrot.slane %v567_v60, 1  ;;  %v373_v33 = vunpack.c.l.b16 %v255_v14  ;;  %v553_v36 = vor.u32 %v552_v4, %v548_v63 }
  0x33   : > { %v540_v24 = vrot.slane %v538_v11, 1  ;;  %v557_v38 = vrot.slane %v555_v10, 1  ;;  %v574_v48 = vshll.u32 %v2067_v22, 16  ;;  %v572_v60 = vshrl.u32 %v2067_v22, 16 }
  0x34   : > { %605 = vrot.lane.b32.xlu2 %v2047_v51, %s1826_s20  ;;  %603 = vrot.lane.b32.xlu1 %v2055_v3, %s1826_s20  ;;  %v543_v32 = vshll.u32 %v2063_v19, 16  ;;  %v2076_v46 = vpack.c.b16 %v373_v33, %v373_v33  ;;  %v2080_v53 = vsel %vm390_vm0, %v565_v28, %v569_v31  ;;  %v619_v4 = vrot.slane %v1921_v39, 1 }
  0x35   : > { %601 = vrot.lane.b32.xlu0 %v2061_v17, %s1826_s20  ;;  %v541_v42 = vor.u32 %v540_v24, %v536_v21  ;;  %v2083_v55 = vsel %vm390_vm0, %v553_v36, %v557_v38  ;;  %v576_v1 = vrot.slane %v574_v48, 1  ;;  %v620_v10 = vrot.slane %v1954_v62, 1 }
  0x36   : > { %v545_v44 = vrot.slane %v543_v32, 1  ;;  %v579_v63 = vshll.u32 %v2076_v46, 16  ;;  %v616_v11 = vrot.slane %v1889_v5, 1  ;;  %v617_v14 = vrot.slane %v1907_v23, 1 }
  0x37   : > { %v577_v21 = vor.u32 %v576_v1, %v572_v60  ;;  %v2101_v28 = vsel %vm615_vm1, %v619_v4, %v620_v10  ;;  %v628_v62 = vrot.slane %v1881_v0, 1  ;;  %v629_v23 = vrot.slane %v1896_v12, 1 }
  0x38   : > { %v2086_v57 = vsel %vm390_vm0, %v541_v42, %v545_v44  ;;  %v581_v24 = vrot.slane %v579_v63, 1  ;;  %v618_v31 = vsel %vm615_vm1, %v616_v11, %v617_v14  ;;  %v625_v33 = vrot.slane %v1915_v30, 1 }
  0x39   : > { %v626_v36 = vrot.slane %v1937_v49, 1  ;;  %v622_v38 = vrot.slane %v1885_v2, 1  ;;  %v623_v42 = vrot.slane %v1903_v18, 1  ;;  %v2119_v44 = vsel %vm615_vm1, %v628_v62, %v629_v23 }
  0x3a   : > { %v2105_v32 = vsel %vm390_vm0, %v577_v21, %v581_v24  ;;  %v637_v12 = vrot.slane %v1948_v59, 1  ;;  %v638_v49 = vrot.slane %v1972_v25, 1  ;;  %v634_v18 = vrot.slane %v1961_v8, 1 }
  0x3b   : > { %v2122_v48 = vsel %vm615_vm1, %v625_v33, %v626_v36  ;;  %v2125_v60 = vsel %vm615_vm1, %v622_v38, %v623_v42  ;;  %v635_v1 = vrot.slane %v1990_v37, 1  ;;  %v631_v63 = vrot.slane %v1901_v16, 1 }
  0x3c   : > { %611 = vrot.lane.b32.xlu2 %v2080_v53, %s1826_s20  ;;  %609 = vrot.lane.b32.xlu1 %v2083_v55, %s1826_s20  ;;  %v632_v4 = vrot.slane %v1912_v29, 1  ;;  %v2140_v10 = vsel %vm615_vm1, %v637_v12, %v638_v49  ;;  %v646_v25 = vrot.slane %v1982_v34, 1  ;;  %v647_v37 = vrot.slane %v2017_v9, 1 }
  0x3d   : > { %607 = vrot.lane.b32.xlu0 %v2086_v57, %s1826_s20  ;;  %v2143_v11 = vsel %vm615_vm1, %v634_v18, %v635_v1  ;;  %v643_v29 = vrot.slane %v2001_v52, 1  ;;  %v644_v21 = vrot.slane %v2031_v26, 1  ;;  %v640_v24 = vrot.slane %v1929_v45, 1 }
  0x3e   : > { %v2146_v14 = vsel %vm615_vm1, %v631_v63, %v632_v4  ;;  %v2161_v62 = vsel %vm615_vm1, %v646_v25, %v647_v37  ;;  %v655_v9 = vrot.slane %v2025_v20, 1  ;;  %v656_v26 = vrot.slane %v2050_v56, 1 }
  0x3f   : > { %2740 = vst [vmem:[#allocation4_spill] sm:$0xff] %v2146_v14  ;;  %v2164_v23 = vsel %vm615_vm1, %v643_v29, %v644_v21  ;;  %v653_v36 = vrot.slane %v2063_v19, 1  ;;  %v649_v38 = vrot.slane %v1975_v27, 1  ;;  %v650_v42 = vrot.slane %v1997_v50, 1 }
  0x40   : > { %2741 = vst [vmem:[#allocation5_spill] sm:$0xff] %v2164_v23  ;;  %v2182_v12 = vsel %vm615_vm1, %v655_v9, %v656_v26  ;;  %v661_v50 = vrot.slane %v2067_v22, 1  ;;  %v662_v56 = vrot.slane %v2076_v46, 1  ;;  %v658_v19 = vrot.slane %v2009_v58, 1 }
  0x41   : > { %v2188_v18 = vsel %vm615_vm1, %v649_v38, %v650_v42  ;;  %v659_v1 = vrot.slane %v2039_v40, 1 }
  0x42   : > { %v2201_v63 = vsel %vm615_vm1, %v661_v50, %v662_v56 }
  0x43   : > { %v2204_v4 = vsel %vm615_vm1, %v658_v19, %v659_v1 }
  0x44   : > { %666 = vrot.lane.b32.xlu2 %v2101_v28, %s1827_s21  ;;  %664 = vrot.lane.b32.xlu1 %v618_v31, %s1827_s21  ;;  %v641_v31 = vrot.slane %v1958_v7, 1  ;;  %v652_v7 = vrot.slane %v2042_v43, 1 }
  0x45   : > { %613 = vrot.lane.b32.xlu0 %v2105_v32, %s1826_s20 }
  0x46   : > { %v2167_v33 = vsel %vm615_vm1, %v640_v24, %v641_v31  ;;  %v2185_v49 = vsel %vm615_vm1, %v652_v7, %v653_v36  ;;  %v2230_v24 = vld [vmem:[%s1878_s19 + $0xc0] sm:$0xff] }
  0x4c   : > { %672 = vrot.lane.b32.xlu2 %v2119_v44, %s1827_s21  ;;  %670 = vrot.lane.b32.xlu1 %v2122_v48, %s1827_s21 }
  0x4d   : > { %668 = vrot.lane.b32.xlu0 %v2125_v60, %s1827_s21 }
  0x54   : > { %678 = vrot.lane.b32.xlu2 %v2140_v10, %s1827_s21  ;;  %676 = vrot.lane.b32.xlu1 %v2143_v11, %s1827_s21 }
  0x55   : > { %674 = vrot.lane.b32.xlu0 %v2146_v14, %s1827_s21 }
  0x5c   : > { %684 = vrot.lane.b32.xlu2 %v2161_v62, %s1827_s21  ;;  %682 = vrot.lane.b32.xlu1 %v2164_v23, %s1827_s21 }
  0x5d   : > { %680 = vrot.lane.b32.xlu0 %v2167_v33, %s1827_s21 }
  0x64   : > { %690 = vrot.lane.b32.xlu2 %v2182_v12, %s1827_s21  ;;  %688 = vrot.lane.b32.xlu1 %v2185_v49, %s1827_s21 }
  0x65   : > { %686 = vrot.lane.b32.xlu0 %v2188_v18, %s1827_s21 }
  0x6c   : > { %701 = vrot.lane.b32.xlu2 %v1921_v39, %s1828_s22  ;;  %694 = vrot.lane.b32.xlu1 %v2201_v63, %s1827_s21 }
  0x6d   : > { %692 = vrot.lane.b32.xlu0 %v2204_v4, %s1827_s21 }
  0x74   : > { %707 = vrot.lane.b32.xlu2 %v1881_v0, %s1828_s22  ;;  %705 = vrot.lane.b32.xlu1 %v1915_v30, %s1828_s22 }
  0x75   : > { %703 = vrot.lane.b32.xlu0 %v1885_v2, %s1828_s22 }
  0x76   : > { %v592_v40 = vpop.permute.xlu2 %591 }
  0x7c   : > { %713 = vrot.lane.b32.xlu2 %v1948_v59, %s1828_s22  ;;  %711 = vrot.lane.b32.xlu1 %v1961_v8, %s1828_s22 }
  0x7d   : > { %709 = vrot.lane.b32.xlu0 %v1901_v16, %s1828_s22 }
  0x7e   : > { %v2217_v46 = vpop.permute.xlu2 %593 }
  0x84   : > { %719 = vrot.lane.b32.xlu2 %v1982_v34, %s1828_s22  ;;  %717 = vrot.lane.b32.xlu1 %v2001_v52, %s1828_s22 }
  0x85   : > { %715 = vrot.lane.b32.xlu0 %v1929_v45, %s1828_s22 }
  0x86   : > { %v2222_v25 = vpop.permute.xlu2 %599 }
  0x8c   : > { %725 = vrot.lane.b32.xlu2 %v2025_v20, %s1828_s22  ;;  %723 = vrot.lane.b32.xlu1 %v2042_v43, %s1828_s22 }
  0x8d   : > { %721 = vrot.lane.b32.xlu0 %v1975_v27, %s1828_s22 }
  0x8e   : > { %v2227_v37 = vpop.permute.xlu2 %605  ;;  %v588_v29 = vpop.permute.xlu1 %587 }
  0x8f   : > { %v584_v21 = vpop.permute.xlu0 %583 }
  0x94   : > { %731 = vrot.lane.b32.xlu2 %v2230_v24, %s1828_s22  ;;  %729 = vrot.lane.b32.xlu1 %v2067_v22, %s1828_s22 }
  0x95   : > { %727 = vrot.lane.b32.xlu0 %v2009_v58, %s1828_s22 }
  0x96   : > { %v2235_v31 = vpop.permute.xlu2 %611  ;;  %v590_v9 = vpop.permute.xlu1 %589 }
  0x97   : > { %v586_v26 = vpop.permute.xlu0 %585 }
  0x98   : > { %v938_v7 = vsel %vm934_vm3, %v1921_v39, %v586_v26  ;;  %v944_v39 = vsel %vm934_vm3, %v1881_v0, %v592_v40 }
  0x9c   : > { %772 = vrot.lane.b32.xlu2 %v2083_v55, %s1829_s23  ;;  %764 = vrot.lane.b32.xlu1 %v2061_v17, %s1829_s23 }
  0x9d   : > { %748 = vrot.lane.b32.xlu0 %v1987_v35, %s1829_s23 }
  0x9e   : > { %v667_v36 = vpop.permute.xlu2 %666  ;;  %v598_v38 = vpop.permute.xlu1 %597 }
  0x9f   : > { %v2246_v42 = vsel %vm967_vm2, %v938_v7, %v667_v36  ;;  %v596_v50 = vpop.permute.xlu0 %595  ;;  %v950_v26 = vsel %vm934_vm3, %v1948_v59, %v598_v38 }
  0xa4   : > { %836 = vrot.lane.b32.xlu2 %v1982_v34, %s1830_s24  ;;  %807 = vrot.lane.b32.xlu1 %v2182_v12, %s1831_s25 }
  0xa5   : > { %799 = vrot.lane.b32.xlu0 %v2164_v23, %s1831_s25  ;;  %v936_v23 = vsel %vm934_vm3, %v1889_v5, %v584_v21  ;;  %v942_v21 = vsel %vm934_vm3, %v1915_v30, %v590_v9  ;;  %v948_v9 = vsel %vm934_vm3, %v1961_v8, %v596_v50  ;;  %v952_v50 = vsel %vm934_vm3, %v1929_v45, %v2222_v25 }
  0xa6   : > { %v673_v35 = vpop.permute.xlu2 %672  ;;  %v604_v56 = vpop.permute.xlu1 %603 }
  0xa7   : > { %v2257_v19 = vsel %vm967_vm2, %v944_v39, %v673_v35  ;;  %v602_v1 = vpop.permute.xlu0 %601  ;;  %v956_v35 = vsel %vm934_vm3, %v1982_v34, %v604_v56 }
  0xac   : > { %891 = vrot.lane.b32.xlu2 %v2080_v53, %s1832_s26  ;;  %883 = vrot.lane.b32.xlu1 %v2055_v3, %s1832_s26 }
  0xad   : > { %844 = vrot.lane.b32.xlu0 %v2009_v58, %s1830_s24 }
  0xae   : > { %v679_v40 = vpop.permute.xlu2 %678  ;;  %v610_v7 = vpop.permute.xlu1 %609 }
  0xaf   : > { %v2268_v36 = vsel %vm967_vm2, %v950_v26, %v679_v40  ;;  %v608_v39 = vpop.permute.xlu0 %607  ;;  %v962_v34 = vsel %vm934_vm3, %v2025_v20, %v610_v7  ;;  %v946_v7 = vsel %vm934_vm3, %v1901_v16, %v2217_v46 }
  0xb4   : > { %756 = vrot.lane.b32.xlu2 %v1952_v61, %s1829_s23  ;;  %926 = vrot.lane.b32.xlu1 %v2204_v4, %s1833_s27 }
  0xb5   : > { %918 = vrot.lane.b32.xlu0 %v2161_v62, %s1833_s27 }
  0xb6   : > { %v685_v38 = vpop.permute.xlu2 %684  ;;  %v665_v40 = vpop.permute.xlu1 %664 }
  0xb7   : > { %v2281_v26 = vsel %vm967_vm2, %v956_v35, %v685_v38  ;;  %v969_v61 = vsel %vm967_vm2, %v936_v23, %v665_v40  ;;  %v614_v17 = vpop.permute.xlu0 %613  ;;  %v940_v35 = vsel %vm934_vm3, %v1885_v2, %v588_v29 }
  0xbc   : > { %820 = vrot.lane.b32.xlu2 %v1885_v2, %s1830_s24  ;;  %791 = vrot.lane.b32.xlu1 %v2146_v14, %s1831_s25 }
  0xbd   : > { %783 = vrot.lane.b32.xlu0 %v2101_v28, %s1831_s25 }
  0xbe   : > { %v691_v5 = vpop.permute.xlu2 %690  ;;  %v671_v23 = vpop.permute.xlu1 %670 }
  0xbf   : > { %v2295_v56 = vsel %vm967_vm2, %v962_v34, %v691_v5  ;;  %v975_v38 = vsel %vm967_vm2, %v942_v21, %v671_v23  ;;  %v669_v40 = vpop.permute.xlu0 %668 }
  0xc0   : > { %v973_v14 = vsel %vm967_vm2, %v940_v35, %v669_v40 }
  0xc4   : > { %875 = vrot.lane.b32.xlu2 %v2020_v13, %s1832_s26  ;;  %867 = vrot.lane.b32.xlu1 %v1935_v47, %s1832_s26 }
  0xc5   : > { %828 = vrot.lane.b32.xlu0 %v1961_v8, %s1830_s24  ;;  %v954_v8 = vsel %vm934_vm3, %v2001_v52, %v602_v1 }
  0xc6   : > { %v702_v28 = vpop.permute.xlu2 %701  ;;  %v677_v29 = vpop.permute.xlu1 %676 }
  0xc7   : > { %v2310_v2 = vsel %vm1000_vm4, %v969_v61, %v702_v28  ;;  %v981_v34 = vsel %vm967_vm2, %v948_v9, %v677_v29  ;;  %v675_v5 = vpop.permute.xlu0 %674  ;;  %v958_v28 = vsel %vm934_vm3, %v1975_v27, %v2227_v37 }
  0xc8   : > { %v979_v21 = vsel %vm967_vm2, %v946_v7, %v675_v5  ;;  %v964_v7 = vsel %vm934_vm3, %v2009_v58, %v2235_v31 }
  0xcc   : > { %766 = vrot.lane.b32.xlu2 %v2055_v3, %s1829_s23  ;;  %910 = vrot.lane.b32.xlu1 %v2143_v11, %s1833_s27 }
  0xcd   : > { %902 = vrot.lane.b32.xlu0 %v2125_v60, %s1833_s27 }
  0xce   : > { %v708_v61 = vpop.permute.xlu2 %707  ;;  %v683_v46 = vpop.permute.xlu1 %682 }
  0xcf   : > { %v2326_v16 = vsel %vm1000_vm4, %v975_v38, %v708_v61  ;;  %v987_v3 = vsel %vm967_vm2, %v954_v8, %v683_v46  ;;  %v681_v23 = vpop.permute.xlu0 %680  ;;  %v960_v38 = vsel %vm934_vm3, %v2042_v43, %v608_v39  ;;  %v966_v39 = vsel %vm934_vm3, %v2067_v22, %v614_v17 }
  0xd0   : > { %v2333_v35 = vsel %vm967_vm2, %v952_v50, %v681_v23 }
  0xd4   : > { %809 = vrot.lane.b32.xlu2 %v2204_v4, %s1831_s25  ;;  %801 = vrot.lane.b32.xlu1 %v2161_v62, %s1831_s25 }
  0xd5   : > { %774 = vrot.lane.b32.xlu0 %v2080_v53, %s1829_s23 }
  0xd6   : > { %v714_v1 = vpop.permute.xlu2 %713  ;;  %v689_v40 = vpop.permute.xlu1 %688 }
  0xd7   : > { %v2344_v25 = vsel %vm1000_vm4, %v981_v34, %v714_v1  ;;  %v2350_v4 = vsel %vm967_vm2, %v960_v38, %v689_v40  ;;  %v687_v9 = vpop.permute.xlu0 %686 }
  0xd8   : > { %v991_v62 = vsel %vm967_vm2, %v958_v28, %v687_v9 }
  0xdc   : > { %885 = vrot.lane.b32.xlu2 %v2047_v51, %s1832_s26  ;;  %846 = vrot.lane.b32.xlu1 %v2067_v22, %s1830_s24 }
  0xdd   : > { %838 = vrot.lane.b32.xlu0 %v1975_v27, %s1830_s24 }
  0xde   : > { %v720_v53 = vpop.permute.xlu2 %719  ;;  %v695_v29 = vpop.permute.xlu1 %694 }
  0xdf   : > { %v2362_v37 = vsel %vm1000_vm4, %v987_v3, %v720_v53  ;;  %v999_v34 = vsel %vm967_vm2, %v966_v39, %v695_v29  ;;  %v693_v5 = vpop.permute.xlu0 %692  ;;  %v1662_v53 = vld [vmem:[%s2731_s1 + $0x8] sm:$0xff]  ;;  %v739_v39 = vshll.u32 %v2230_v24, 16 }
  0xe0   : > { %v997_v61 = vsel %vm967_vm2, %v964_v7, %v693_v5  ;;  %v737_v5 = vshrl.u32 %v2230_v24, 16 }
  0xe4   : > { %928 = vrot.lane.b32.xlu2 %v2201_v63, %s1833_s27  ;;  %920 = vrot.lane.b32.xlu1 %v2188_v18, %s1833_s27 }
  0xe5   : > { %893 = vrot.lane.b32.xlu0 %v2105_v32, %s1832_s26 }
  0xe6   : > { %v2375_v27 = vpop.permute.xlu2 %725  ;;  %v706_v17 = vpop.permute.xlu1 %705 }
  0xe7   : > { %v2378_v22 = vsel %vm1000_vm4, %v973_v14, %v706_v17  ;;  %v704_v58 = vpop.permute.xlu0 %703  ;;  %v741_v17 = vrot.slane %v739_v39, 1 }
  0xe8   : > { %v2382_v31 = vsel %vm1000_vm4, %v2246_v42, %v704_v58 }
  0xec   : > { %785 = vrot.lane.b32.xlu2 %v2125_v60, %s1831_s25  ;;  %758 = vrot.lane.b32.xlu1 %v2020_v13, %s1829_s23 }
  0xed   : > { %750 = vrot.lane.b32.xlu0 %v1935_v47, %s1829_s23 }
  0xee   : > { %v732_v8 = vpop.permute.xlu2 %731  ;;  %v712_v14 = vpop.permute.xlu1 %711 }
  0xef   : > { %v2391_v46 = vsel %vm1000_vm4, %v999_v34, %v732_v8  ;;  %v2394_v50 = vsel %vm1000_vm4, %v979_v21, %v712_v14  ;;  %v710_v3 = vpop.permute.xlu0 %709  ;;  %v742_v8 = vor.u32 %v741_v17, %v737_v5  ;;  %v261_v5 = vld [vmem:[%s1878_s19 + $0xd4] sm:$0x1] }
  0xf0   : > { %v2398_v42 = vsel %vm1000_vm4, %v2257_v19, %v710_v3  ;;  %v1202_v19 = vld [vmem:[%s2731_s1 + $0x10] sm:$0x3] }
  0xf4   : > { %830 = vrot.lane.b32.xlu2 %v1948_v59, %s1830_s24  ;;  %822 = vrot.lane.b32.xlu1 %v1915_v30, %s1830_s24  ;;  %v1216_v59 = vunpack.c.l.b16 %v1202_v19 }
  0xf5   : > { %793 = vrot.lane.b32.xlu0 %v2143_v11, %s1831_s25 }
  0xf6   : > { %v2406_v47 = vpop.permute.xlu2 %772  ;;  %v2408_v13 = vpop.permute.xlu1 %717  ;;  %v1219_v30 = vpack.c.b16 %v1216_v59, %v1216_v59 }
  0xf7   : > { %v716_v60 = vpop.permute.xlu0 %715 }
  0xf8   : > { %v2412_v21 = vsel %vm1000_vm4, %v2268_v36, %v716_v60  ;;  %v258_v36 = vld [vmem:[%s1878_s19 + $0xc8] sm:$0x1]  ;;  %v1257_v23 = vsel %vm1255_vm5, %v1219_v30, 0 }
  0xf9   : > { %1759 = vmatpush.bf16.msra.mxu2 %v1257_v23  ;;  %1760 = vmatpush.bf16.msra.mxu3 %v1257_v23  ;;  %v734_v9 = vunpack.c.l.b16 %v258_v36 }
  0xfa   : > { %1264 = vmatpush.bf16.msra.mxu0 %v1257_v23  ;;  %1758 = vmatpush.bf16.msra.mxu1 %v1257_v23 }
  0xfc   : > { %904 = vrot.lane.b32.xlu2 %v2122_v48, %s1833_s27  ;;  %877 = vrot.lane.b32.xlu1 %v2015_v6, %s1832_s26 }
  0xfd   : > { %869 = vrot.lane.b32.xlu0 %v1967_v15, %s1832_s26  ;;  %1762 = vmatpush.bf16.msra.mxu2 %v1662_v53 }
  0xfe   : > { %v2423_v11 = vpop.permute.xlu2 %836  ;;  %v724_v1 = vpop.permute.xlu1 %723  ;;  %1763 = vmatpush.bf16.msra.mxu3 %v1662_v53  ;;  %1265 = vmatpush.bf16.msra.mxu0 %v1662_v53 }
  0xff   : > { %v2427_v38 = vsel %vm1000_vm4, %v991_v62, %v724_v1  ;;  %v722_v40 = vpop.permute.xlu0 %721  ;;  %v735_v62 = vpack.c.b16 %v734_v9, %v734_v9  ;;  %1761 = vmatpush.bf16.msra.mxu1 %v1662_v53  ;;  %v1026_v1 = vsel %vm1000_vm4, %v2350_v4, %v2375_v27 }
 0x100   : > { %v2431_v28 = vsel %vm1000_vm4, %v2281_v26, %v722_v40  ;;  %v1661_v26 = vld [vmem:[%s2731_s1] sm:$0xff]  ;;  %v1059_v40 = vsel %vm1033_vm6, %v1026_v1, %v2406_v47 }
 0x101   : > { %1765 = vmatpush.bf16.msra.mxu2 %v1661_v26  ;;  %v744_v58 = vshll.u32 %v735_v62, 16 }
 0x102   : > { %1766 = vmatpush.bf16.msra.mxu3 %v1661_v26  ;;  %1266 = vmatpush.bf16.msra.mxu0 %v1661_v26 }
 0x103   : > { %1764 = vmatpush.bf16.msra.mxu1 %v1661_v26 }
 0x104   : > { %776 = vrot.lane.b32.xlu2 %v2105_v32, %s1829_s23  ;;  %768 = vrot.lane.b32.xlu1 %v2047_v51, %s1829_s23 }
 0x105   : > { %912 = vrot.lane.b32.xlu0 %v2140_v10, %s1833_s27 }
 0x106   : > { %v892_v29 = vpop.permute.xlu2 %891  ;;  %v730_v7 = vpop.permute.xlu1 %729 }
 0x107   : > { %v2447_v32 = vsel %vm1000_vm4, %v997_v61, %v730_v7  ;;  %v728_v34 = vpop.permute.xlu0 %727  ;;  %v746_v61 = vrot.slane %v744_v58, 1  ;;  %v853_v58 = vunpack.c.l.b16 %v261_v5  ;;  %v2743_v5 = vld [vmem:[#allocation2_spill] sm:$0xff] }
 0x108   : > { %v2451_v51 = vsel %vm1000_vm4, %v2295_v56, %v728_v34 }
 0x109   : > { %v2461_v60 = vsel %vm390_vm0, %v742_v8, %v746_v61 }
 0x10c   : > { %840 = vrot.lane.b32.xlu2 %v2042_v43, %s1830_s24  ;;  %811 = vrot.lane.b32.xlu1 %v2201_v63, %s1831_s25  ;;  %v780_v63 = vrot.slane %v2230_v24, 1 }
 0x10d   : > { %803 = vrot.lane.b32.xlu0 %v2188_v18, %s1831_s25  ;;  %v781_v18 = vrot.slane %v735_v62, 1 }
 0x10e   : > { %v757_v14 = vpop.permute.xlu2 %756  ;;  %v765_v3 = vpop.permute.xlu1 %764 }
 0x10f   : > { %v749_v56 = vpop.permute.xlu0 %748  ;;  %v2473_v30 = vsel %vm615_vm1, %v780_v63, %v781_v18 }
 0x110   : > { %v1035_v8 = vsel %vm1033_vm6, %v2310_v2, %v749_v56 }
 0x114   : > { %895 = vrot.lane.b32.xlu2 %v2461_v60, %s1832_s26  ;;  %887 = vrot.lane.b32.xlu1 %v2086_v57, %s1832_s26 }
 0x115   : > { %848 = vrot.lane.b32.xlu0 %v2230_v24, %s1830_s24 }
 0x116   : > { %v2469_v43 = vpop.permute.xlu2 %820  ;;  %v808_v19 = vpop.permute.xlu1 %807 }
 0x117   : > { %v800_v59 = vpop.permute.xlu0 %799  ;;  %v1092_v53 = vsel %vm1066_vm7, %v1059_v40, %v808_v19 }
 0x11c   : > { %752 = vrot.lane.b32.xlu2 %v1967_v15, %s1829_s23  ;;  %930 = vrot.lane.b32.xlu1 %v2473_v30, %s1833_s27  ;;  %v1018_v15 = vsel %vm1000_vm4, %v2333_v35, %v2408_v13 }
 0x11d   : > { %922 = vrot.lane.b32.xlu0 %v2185_v49, %s1833_s27  ;;  %v1051_v9 = vsel %vm1033_vm6, %v1018_v15, %v765_v3 }
 0x11e   : > { %v876_v36 = vpop.permute.xlu2 %875  ;;  %v884_v23 = vpop.permute.xlu1 %883  ;;  %v1084_v62 = vsel %vm1066_vm7, %v1051_v9, %v800_v59 }
 0x11f   : > { %v845_v24 = vpop.permute.xlu0 %844  ;;  %v1117_v4 = vsel %vm1099_vm8, %v1084_v62, %v2423_v11 }
 0x120   : > { %v1125_v39 = vsel %vm1099_vm8, %v1092_v53, %v845_v24  ;;  %v1150_v13 = vsel %vm1132_vm9, %v1117_v4, %v884_v23 }
 0x121   : > { %v1158_v47 = vsel %vm1132_vm9, %v1125_v39, %v892_v29 }
 0x124   : > { %795 = vrot.lane.b32.xlu2 %v2140_v10, %s1831_s25  ;;  %787 = vrot.lane.b32.xlu1 %v2122_v48, %s1831_s25 }
 0x125   : > { %760 = vrot.lane.b32.xlu0 %v2015_v6, %s1829_s23 }
 0x126   : > { %v2499_v35 = vpop.permute.xlu2 %766  ;;  %v927_v27 = vpop.permute.xlu1 %926 }
 0x127   : > { %v919_v26 = vpop.permute.xlu0 %918  ;;  %v1191_v10 = vsel %vm1165_vm10, %v1158_v47, %v927_v27 }
 0x128   : > { %v1183_v48 = vsel %vm1165_vm10, %v1150_v13, %v919_v26  ;;  %1636 = vmatmul.msk.bf16.vlgmr.msra.gmra.mxu3 %vm1222_vm11, %v1191_v10 }
 0x129   : > { %1632 = vmatmul.msk.bf16.vlgmr.msra.gmra.mxu2 %vm1222_vm11, %v1183_v48 }
 0x12c   : > { %871 = vrot.lane.b32.xlu2 %v1925_v41, %s1832_s26  ;;  %832 = vrot.lane.b32.xlu1 %v1929_v45, %s1830_s24  ;;  %v1043_v45 = vsel %vm1033_vm6, %v2398_v42, %v757_v14  ;;  %v854_v14 = vpack.c.b16 %v853_v58, %v853_v58  ;;  %v2744_v58 = vld [vmem:[#allocation5_spill] sm:$0xff] }
 0x12d   : > { %824 = vrot.lane.b32.xlu0 %v1881_v0, %s1830_s24  ;;  %v1660_v0 = vld [vmem:[%s1878_s19 + $0xcc] sm:$0xff] }
 0x12e   : > { %v810_v6 = vpop.permute.xlu2 %809  ;;  %v792_v11 = vpop.permute.xlu1 %791  ;;  %v858_v18 = vshll.u32 %v1660_v0, 16  ;;  %v863_v1 = vshll.u32 %v854_v14, 16  ;;  %v900_v39 = vrot.slane %v854_v14, 1 }
 0x12f   : > { %v784_v29 = vpop.permute.xlu0 %783  ;;  %v1076_v61 = vsel %vm1066_vm7, %v1043_v45, %v792_v11 }
 0x130   : > { %v1068_v3 = vsel %vm1066_vm7, %v1035_v8, %v784_v29  ;;  %v1801_v29 = vld [vmem:[%s1878_s19 + $0x3c] sm:$0xff] }
 0x131   : > { %v1101_v2 = vsel %vm1099_vm8, %v1068_v3, %v2469_v43 }
 0x134   : > { %914 = vrot.lane.b32.xlu2 %v2167_v33, %s1833_s27  ;;  %906 = vrot.lane.b32.xlu1 %v2119_v44, %s1833_s27 }
 0x135   : > { %879 = vrot.lane.b32.xlu0 %v2005_v54, %s1832_s26 }
 0x136   : > { %v886_v7 = vpop.permute.xlu2 %885  ;;  %v868_v34 = vpop.permute.xlu1 %867 }
 0x137   : > { %v829_v17 = vpop.permute.xlu0 %828  ;;  %v1134_v59 = vsel %vm1132_vm9, %v1101_v2, %v868_v34  ;;  %v2742_v34 = vld [vmem:[#allocation3_spill] sm:$0xff] }
 0x138   : > { %v1109_v63 = vsel %vm1099_vm8, %v1076_v61, %v829_v17 }
 0x139   : > { %v1142_v19 = vsel %vm1132_vm9, %v1109_v63, %v876_v36  ;;  %v865_v36 = vrot.slane %v863_v1, 1 }
 0x13c   : > { %805 = vrot.lane.b32.xlu2 %v2185_v49, %s1831_s25  ;;  %778 = vrot.lane.b32.xlu1 %v2461_v60, %s1829_s23  ;;  %v860_v60 = vrot.slane %v858_v18, 1 }
 0x13d   : > { %770 = vrot.lane.b32.xlu0 %v2086_v57, %s1829_s23  ;;  %v856_v57 = vshrl.u32 %v1660_v0, 16 }
 0x13e   : > { %v929_v42 = vpop.permute.xlu2 %928  ;;  %v911_v56 = vpop.permute.xlu1 %910 }
 0x13f   : > { %v903_v23 = vpop.permute.xlu0 %902  ;;  %v1175_v49 = vsel %vm1165_vm10, %v1142_v19, %v911_v56  ;;  %v861_v43 = vor.u32 %v860_v60, %v856_v57 }
 0x140   : > { %v1167_v24 = vsel %vm1165_vm10, %v1134_v59, %v903_v23  ;;  %1628 = vmatmul.msk.bf16.vlgmr.msra.gmra.mxu1 %vm1222_vm11, %v1175_v49 }
 0x141   : > { %1624 = vmatmul.msk.bf16.vlgmr.msra.gmra.mxu0 %vm1222_vm11, %v1167_v24  ;;  %v866_v53 = vsel %vm390_vm0, %v861_v43, %v865_v36 }
 0x144   : > { %850 = vrot.lane.b32.xlu2 %v1660_v0, %s1830_s24  ;;  %842 = vrot.lane.b32.xlu1 %v2025_v20, %s1830_s24  ;;  %v899_v20 = vrot.slane %v1660_v0, 1 }
 0x145   : > { %813 = vrot.lane.b32.xlu0 %v2473_v30, %s1831_s25  ;;  %v1053_v30 = vsel %vm1033_vm6, %v2362_v37, %v2499_v35 }
 0x146   : > { %v802_v40 = vpop.permute.xlu1 %801  ;;  %v786_v15 = vpop.permute.xlu2 %785  ;;  %v901_v13 = vsel %vm615_vm1, %v899_v20, %v900_v39 }
 0x147   : > { %v775_v9 = vpop.permute.xlu0 %774  ;;  %v1086_v47 = vsel %vm1066_vm7, %v1053_v30, %v802_v40 }
 0x14c   : > { %924 = vrot.lane.b32.xlu2 %v2182_v12, %s1833_s27  ;;  %897 = vrot.lane.b32.xlu1 %v866_v53, %s1832_s26  ;;  %v1061_v12 = vsel %vm1033_vm6, %v2451_v51, %v775_v9 }
 0x14d   : > { %889 = vrot.lane.b32.xlu0 %v2083_v55, %s1832_s26  ;;  %v1094_v55 = vsel %vm1066_vm7, %v1061_v12, %v810_v6 }
 0x14e   : > { %v847_v62 = vpop.permute.xlu1 %846  ;;  %v831_v27 = vpop.permute.xlu2 %830 }
 0x14f   : > { %v839_v4 = vpop.permute.xlu0 %838  ;;  %v1127_v10 = vsel %vm1099_vm8, %v1094_v55, %v847_v62 }
 0x150   : > { %v1119_v26 = vsel %vm1099_vm8, %v1086_v47, %v839_v4 }
 0x151   : > { %v1152_v35 = vsel %vm1132_vm9, %v1119_v26, %v886_v7 }
 0x154   : > { %762 = vrot.lane.b32.xlu2 %v2005_v54, %s1829_s23  ;;  %754 = vrot.lane.b32.xlu1 %v1925_v41, %s1829_s23 }
 0x155   : > { %932 = vrot.lane.b32.xlu0 %v901_v13, %s1833_s27 }
 0x156   : > { %v921_v37 = vpop.permute.xlu1 %920  ;;  %v905_v41 = vpop.permute.xlu2 %904 }
 0x157   : > { %v894_v48 = vpop.permute.xlu0 %893  ;;  %v1185_v51 = vsel %vm1165_vm10, %v1152_v35, %v921_v37 }
 0x158   : > { %v1160_v11 = vsel %vm1132_vm9, %v1127_v10, %v894_v48  ;;  %1633 = vmatmul.msk.bf16.gmra.mxu2 %vm1222_vm11, %v1185_v51 }
 0x159   : > { %v1193_v54 = vsel %vm1165_vm10, %v1160_v11, %v929_v42 }
 0x15a   : > { %1637 = vmatmul.msk.bf16.gmra.mxu3 %vm1222_vm11, %v1193_v54 }
 0x15c   : > { %826 = vrot.lane.b32.xlu2 %v1801_v29, %s1830_s24  ;;  %797 = vrot.lane.b32.xlu1 %v2167_v33, %s1831_s25 }
 0x15d   : > { %789 = vrot.lane.b32.xlu0 %v2119_v44, %s1831_s25  ;;  %v2745_v44 = vld [vmem:[#allocation4_spill] sm:$0xff] }
 0x15e   : > { %v759_v6 = vpop.permute.xlu1 %758  ;;  %v777_v17 = vpop.permute.xlu2 %776 }
 0x15f   : > { %v751_v7 = vpop.permute.xlu0 %750  ;;  %v1063_v43 = vsel %vm1033_vm6, %v2447_v32, %v777_v17  ;;  %v2637_v17 = vld [vmem:[%s2732_s2] ss:$0 sm:$0xff] }
 0x160   : > { %v1037_v33 = vsel %vm1033_vm6, %v2382_v31, %v751_v7  ;;  %v1045_v31 = vsel %vm1033_vm6, %v2394_v50, %v759_v6 }
 0x161   : > { %v1070_v8 = vsel %vm1066_vm7, %v1037_v33, %v786_v15 }
 0x164   : > { %881 = vrot.lane.b32.xlu2 %v2742_v34, %s1832_s26  ;;  %873 = vrot.lane.b32.xlu1 %v2743_v5, %s1832_s26 }
 0x165   : > { %834 = vrot.lane.b32.xlu0 %v2001_v52, %s1830_s24 }
 0x166   : > { %v823_v45 = vpop.permute.xlu1 %822  ;;  %v841_v3 = vpop.permute.xlu2 %840 }
 0x167   : > { %v794_v0 = vpop.permute.xlu0 %793  ;;  %v1103_v63 = vsel %vm1099_vm8, %v1070_v8, %v823_v45 }
 0x168   : > { %v1078_v18 = vsel %vm1066_vm7, %v1045_v31, %v794_v0 }
 0x169   : > { %v1111_v2 = vsel %vm1099_vm8, %v1078_v18, %v831_v27 }
 0x16c   : > { %916 = vrot.lane.b32.xlu1 %v2744_v58, %s1833_s27 }
 0x16d   : > { %908 = vrot.lane.b32.xlu0 %v2745_v44, %s1833_s27 }
 0x16e   : > { %v878_v61 = vpop.permute.xlu1 %877  ;;  %v896_v49 = vpop.permute.xlu2 %895 }
 0x16f   : > { %v870_v42 = vpop.permute.xlu0 %869  ;;  %v1144_v19 = vsel %vm1132_vm9, %v1111_v2, %v878_v61 }
 0x170   : > { %v1136_v52 = vsel %vm1132_vm9, %v1103_v63, %v870_v42 }
 0x171   : > { %v1169_v14 = vsel %vm1165_vm10, %v1136_v52, %v905_v41 }
 0x172   : > { %1625 = vmatmul.msk.bf16.gmra.mxu0 %vm1222_vm11, %v1169_v14 }
 0x176   : > { %v769_v56 = vpop.permute.xlu1 %768  ;;  %v753_v60 = vpop.permute.xlu2 %752 }
 0x177   : > { %v913_v59 = vpop.permute.xlu0 %912  ;;  %v1055_v36 = vsel %vm1033_vm6, %v2431_v28, %v769_v56  ;;  %v1039_v55 = vsel %vm1033_vm6, %v2378_v22, %v753_v60 }
 0x178   : > { %v1177_v23 = vsel %vm1165_vm10, %v1144_v19, %v913_v59 }
 0x179   : > { %1629 = vmatmul.msk.bf16.gmra.mxu1 %vm1222_vm11, %v1177_v23 }
 0x17e   : > { %v812_v24 = vpop.permute.xlu1 %811  ;;  %v796_v53 = vpop.permute.xlu2 %795 }
 0x17f   : > { %v804_v57 = vpop.permute.xlu0 %803  ;;  %v1096_v40 = vsel %vm1066_vm7, %v1063_v43, %v812_v24 }
 0x180   : > { %v1088_v15 = vsel %vm1066_vm7, %v1055_v36, %v804_v57 }
 0x181   : > { %v1121_v62 = vsel %vm1099_vm8, %v1088_v15, %v841_v3 }
 0x186   : > { %v888_v1 = vpop.permute.xlu1 %887  ;;  %v872_v47 = vpop.permute.xlu2 %871 }
 0x187   : > { %v849_v50 = vpop.permute.xlu0 %848  ;;  %v1154_v4 = vsel %vm1132_vm9, %v1121_v62, %v888_v1 }
 0x188   : > { %v1129_v9 = vsel %vm1099_vm8, %v1096_v40, %v849_v50 }
 0x189   : > { %v1162_v39 = vsel %vm1132_vm9, %v1129_v9, %v896_v49 }
 0x18e   : > { %v931_v20 = vpop.permute.xlu1 %930  ;;  %v915_v37 = vpop.permute.xlu2 %914 }
 0x18f   : > { %v923_v30 = vpop.permute.xlu0 %922  ;;  %v1195_v32 = vsel %vm1165_vm10, %v1162_v39, %v931_v20 }
 0x190   : > { %v1187_v27 = vsel %vm1165_vm10, %v1154_v4, %v923_v30  ;;  %1638 = vmatmul.msk.bf16.gmra.mxu3 %vm1222_vm11, %v1195_v32 }
 0x191   : > { %1634 = vmatmul.msk.bf16.gmra.mxu2 %vm1222_vm11, %v1187_v27 }
 0x196   : > { %v788_v28 = vpop.permute.xlu1 %787 }
 0x197   : > { %v761_v13 = vpop.permute.xlu0 %760  ;;  %v1072_v35 = vsel %vm1066_vm7, %v1039_v55, %v788_v28 }
 0x198   : > { %v1047_v10 = vsel %vm1033_vm6, %v2344_v25, %v761_v13  ;;  %v806_v25 = vpop.permute.xlu2 %805 }
 0x199   : > { %v1080_v51 = vsel %vm1066_vm7, %v1047_v10, %v796_v53 }
 0x19e   : > { %v833_v12 = vpop.permute.xlu1 %832 }
 0x19f   : > { %v825_v26 = vpop.permute.xlu0 %824  ;;  %v1113_v41 = vsel %vm1099_vm8, %v1080_v51, %v833_v12 }
 0x1a0   : > { %v1105_v48 = vsel %vm1099_vm8, %v1072_v35, %v825_v26  ;;  %v851_v3 = vpop.permute.xlu2 %850 }
 0x1a1   : > { %v1138_v54 = vsel %vm1132_vm9, %v1105_v48, %v872_v47 }
 0x1a6   : > { %v907_v11 = vpop.permute.xlu1 %906 }
 0x1a7   : > { %v880_v29 = vpop.permute.xlu0 %879  ;;  %v1171_v6 = vsel %vm1165_vm10, %v1138_v54, %v907_v11 }
 0x1a8   : > { %v1146_v22 = vsel %vm1132_vm9, %v1113_v41, %v880_v29  ;;  %1626 = vmatmul.msk.bf16.gmra.mxu0 %vm1222_vm11, %v1171_v6  ;;  %v925_v60 = vpop.permute.xlu2 %924 }
 0x1a9   : > { %v1179_v7 = vsel %vm1165_vm10, %v1146_v22, %v915_v37 }
 0x1aa   : > { %1630 = vmatmul.msk.bf16.gmra.mxu1 %vm1222_vm11, %v1179_v7 }
 0x1ab   : > { %v1328_v34 = vpop.f32.mrf.mxu3 }
 0x1ac   : > { %v1308_v5 = vpop.f32.mrf.mxu2  ;;  %v1329_v33 = vadd.f32 %v2637_v17, %v1328_v34 }
 0x1ad   : > { %v1309_v58 = vadd.f32 %v2637_v17, %v1308_v5 }
 0x1ae   : > { %v779_v45 = vpop.permute.xlu1 %778  ;;  %v1372_v42 = vmax.f32 %v1329_v33, 0.0 }
 0x1af   : > { %v771_v0 = vpop.permute.xlu0 %770  ;;  %v1364_v31 = vmax.f32 %v1309_v58, 0.0  ;;  %v1065_v40 = vsel %vm1033_vm6, %v2391_v46, %v779_v45 }
 0x1b0   : > { %v1057_v59 = vsel %vm1033_vm6, %v2427_v38, %v771_v0  ;;  %v763_v13 = vpop.permute.xlu2 %762 }
 0x1b1   : > { %v1090_v49 = vsel %vm1066_vm7, %v1057_v59, %v806_v25  ;;  %v1049_v54 = vsel %vm1033_vm6, %v2412_v21, %v763_v13 }
 0x1b3   : > { %v1330_v44 = vpop.f32.mrf.mxu3 }
 0x1b4   : > { %v1310_v8 = vpop.f32.mrf.mxu2  ;;  %v1331_v61 = vadd.f32 %v2637_v17, %v1330_v44 }
 0x1b5   : > { %v1311_v63 = vadd.f32 %v2637_v17, %v1310_v8 }
 0x1b6   : > { %v1373_v52 = vmax.f32 %v1331_v61, 0.0  ;;  %v843_v14 = vpop.permute.xlu1 %842 }
 0x1b7   : > { %v1365_v18 = vmax.f32 %v1311_v63, 0.0  ;;  %v814_v2 = vpop.permute.xlu0 %813  ;;  %v1123_v1 = vsel %vm1099_vm8, %v1090_v49, %v843_v14 }
 0x1b8   : > { %v1726_v56 = vpack.c.bf16 %v1373_v52, %v1372_v42  ;;  %v1098_v38 = vsel %vm1066_vm7, %v1065_v40, %v814_v2  ;;  %v827_v48 = vpop.permute.xlu2 %826 }
 0x1b9   : > { %v1706_v19 = vpack.c.bf16 %v1365_v18, %v1364_v31  ;;  %v1131_v62 = vsel %vm1099_vm8, %v1098_v38, %v851_v3 }
 0x1ba   : > { %1754 = vst [vmem:[%s2647_s16 + $0x60] sm:$0xff] %v1726_v56  }
 0x1bb   : > { %1750 = vst [vmem:[%s2647_s16 + $0x40] sm:$0xff] %v1706_v19  }
 0x1bd   : > { %v1288_v23 = vpop.f32.mrf.mxu1 }
 0x1be   : > { %v1268_v24 = vpop.f32.mrf.mxu0  ;;  %v898_v57 = vpop.permute.xlu1 %897  ;;  %v1289_v15 = vadd.f32 %v2637_v17, %v1288_v23 }
 0x1bf   : > { %v890_v50 = vpop.permute.xlu0 %889  ;;  %v1269_v9 = vadd.f32 %v2637_v17, %v1268_v24  ;;  %v1164_v30 = vsel %vm1132_vm9, %v1131_v62, %v898_v57 }
 0x1c0   : > { %v1156_v43 = vsel %vm1132_vm9, %v1123_v1, %v890_v50  ;;  %v1356_v27 = vmax.f32 %v1289_v15, 0.0  ;;  %v882_v7 = vpop.permute.xlu2 %881 }
 0x1c1   : > { %v1189_v36 = vsel %vm1165_vm10, %v1156_v43, %v925_v60  ;;  %v1348_v12 = vmax.f32 %v1269_v9, 0.0 }
 0x1c2   : > { %1635 = vmatmul.msk.bf16.gmra.mxu2 %vm1222_vm11, %v1189_v36 }
 0x1c5   : > { %v1290_v53 = vpop.f32.mrf.mxu1 }
 0x1c6   : > { %v1270_v20 = vpop.f32.mrf.mxu0  ;;  %v1291_v39 = vadd.f32 %v2637_v17, %v1290_v53  ;;  %v755_v4 = vpop.permute.xlu1 %754 }
 0x1c7   : > { %v1271_v46 = vadd.f32 %v2637_v17, %v1270_v20  ;;  %v933_v32 = vpop.permute.xlu0 %932  ;;  %v1041_v41 = vsel %vm1033_vm6, %v2326_v16, %v755_v4 }
 0x1c8   : > { %v1357_v28 = vmax.f32 %v1291_v39, 0.0  ;;  %v1197_v47 = vsel %vm1165_vm10, %v1164_v30, %v933_v32 }
 0x1c9   : > { %v1349_v26 = vmax.f32 %v1271_v46, 0.0  ;;  %1639 = vmatmul.msk.bf16.gmra.mxu3 %vm1222_vm11, %v1197_v47 }
 0x1ca   : > { %v1686_v55 = vpack.c.bf16 %v1357_v28, %v1356_v27 }
 0x1cb   : > { %v1666_v37 = vpack.c.bf16 %v1349_v26, %v1348_v12 }
 0x1cc   : > { %1746 = vst [vmem:[%s2647_s16 + $0x20] sm:$0xff] %v1686_v55  }
 0x1cd   : > { %1667 = vst [vmem:[%s2647_s16] sm:$0xff] %v1666_v37  }
 0x1ce   : > { %v798_v35 = vpop.permute.xlu1 %797 }
 0x1cf   : > { %v790_v10 = vpop.permute.xlu0 %789  ;;  %v1082_v29 = vsel %vm1066_vm7, %v1049_v54, %v798_v35 }
 0x1d0   : > { %v1074_v6 = vsel %vm1066_vm7, %v1041_v41, %v790_v10 }
 0x1d1   : > { %v1107_v5 = vsel %vm1099_vm8, %v1074_v6, %v827_v48 }
 0x1d6   : > { %v874_v51 = vpop.permute.xlu1 %873 }
 0x1d7   : > { %v835_v11 = vpop.permute.xlu0 %834  ;;  %v1140_v33 = vsel %vm1132_vm9, %v1107_v5, %v874_v51 }
 0x1d8   : > { %v1115_v22 = vsel %vm1099_vm8, %v1082_v29, %v835_v11 }
 0x1d9   : > { %v1148_v45 = vsel %vm1132_vm9, %v1115_v22, %v882_v7 }
 0x1db   : > { %v1313_v25 = vpop.f32.mrf.mxu2 }
 0x1dc   : > { %v1314_v44 = vadd.f32 %v2637_v17, %v1313_v25 }
 0x1dd   : > { %v1333_v34 = vpop.f32.mrf.mxu3 }
 0x1de   : > { %v917_v0 = vpop.permute.xlu1 %916  ;;  %v1334_v61 = vadd.f32 %v2637_v17, %v1333_v34  ;;  %v1366_v42 = vmax.f32 %v1314_v44, 0.0 }
 0x1df   : > { %v909_v21 = vpop.permute.xlu0 %908  ;;  %v1181_v16 = vsel %vm1165_vm10, %v1148_v45, %v917_v0 }
 0x1e0   : > { %v1173_v58 = vsel %vm1165_vm10, %v1140_v33, %v909_v21  ;;  %1631 = vmatmul.msk.bf16.gmra.mxu1 %vm1222_vm11, %v1181_v16  ;;  %v1374_v31 = vmax.f32 %v1334_v61, 0.0 }
 0x1e1   : > { %1627 = vmatmul.msk.bf16.gmra.mxu0 %vm1222_vm11, %v1173_v58 }
 0x1e3   : > { %v1315_v8 = vpop.f32.mrf.mxu2 }
 0x1e4   : > { %v1316_v3 = vadd.f32 %v2637_v17, %v1315_v8 }
 0x1e5   : > { %v1335_v63 = vpop.f32.mrf.mxu3 }
 0x1e6   : > { %v1367_v52 = vmax.f32 %v1316_v3, 0.0  ;;  %v1336_v14 = vadd.f32 %v2637_v17, %v1335_v63 }
 0x1e8   : > { %v1711_v18 = vpack.c.bf16 %v1367_v52, %v1366_v42  ;;  %v1375_v2 = vmax.f32 %v1336_v14, 0.0 }
 0x1ea   : > { %1751 = vst [vmem:[%s2647_s16 + $0x48] sm:$0xff] %v1711_v18   ;;  %v1731_v56 = vpack.c.bf16 %v1375_v2, %v1374_v31 }
 0x1ec   : > { %1755 = vst [vmem:[%s2647_s16 + $0x68] sm:$0xff] %v1731_v56  }
 0x1ef   : > { %v1273_v19 = vpop.f32.mrf.mxu0 }
 0x1f0   : > { %v1274_v59 = vadd.f32 %v2637_v17, %v1273_v19 }
 0x1f2   : > { %v1350_v57 = vmax.f32 %v1274_v59, 0.0 }
 0x1f6   : > { %v1293_v23 = vpop.f32.mrf.mxu1 }
 0x1f7   : > { %v1275_v49 = vpop.f32.mrf.mxu0  ;;  %v1294_v50 = vadd.f32 %v2637_v17, %v1293_v23 }
 0x1f8   : > { %v1276_v24 = vadd.f32 %v2637_v17, %v1275_v49 }
 0x1f9   : > { %v1358_v40 = vmax.f32 %v1294_v50, 0.0 }
 0x1fa   : > { %v1351_v60 = vmax.f32 %v1276_v24, 0.0 }
 0x1fc   : > { %v1671_v1 = vpack.c.bf16 %v1351_v60, %v1350_v57 }
 0x1fe   : > { %1743 = vst [vmem:[%s2647_s16 + $0x8] sm:$0xff] %v1671_v1   ;;  %v1295_v43 = vpop.f32.mrf.mxu1 }
 0x1ff   : > { %v1296_v36 = vadd.f32 %v2637_v17, %v1295_v43 }
 0x201   : > { %v1359_v38 = vmax.f32 %v1296_v36, 0.0 }
 0x203   : > { %v1691_v15 = vpack.c.bf16 %v1359_v38, %v1358_v40 }
 0x205   : > { %1747 = vst [vmem:[%s2647_s16 + $0x28] sm:$0xff] %v1691_v15  }
 0x213   : > { %v1338_v9 = vpop.f32.mrf.mxu3 }
 0x214   : > { %v1318_v53 = vpop.f32.mrf.mxu2  ;;  %v1339_v62 = vadd.f32 %v2637_v17, %v1338_v9 }
 0x215   : > { %v1319_v20 = vadd.f32 %v2637_v17, %v1318_v53 }
 0x216   : > { %v1376_v32 = vmax.f32 %v1339_v62, 0.0 }
 0x217   : > { %v1368_v28 = vmax.f32 %v1319_v20, 0.0 }
 0x21b   : > { %v1340_v39 = vpop.f32.mrf.mxu3 }
 0x21c   : > { %v1320_v4 = vpop.f32.mrf.mxu2  ;;  %v1341_v30 = vadd.f32 %v2637_v17, %v1340_v39 }
 0x21d   : > { %v1321_v46 = vadd.f32 %v2637_v17, %v1320_v4 }
 0x21e   : > { %v1377_v27 = vmax.f32 %v1341_v30, 0.0 }
 0x21f   : > { %v1369_v47 = vmax.f32 %v1321_v46, 0.0 }
 0x220   : > { %v1736_v13 = vpack.c.bf16 %v1377_v27, %v1376_v32 }
 0x221   : > { %v1716_v12 = vpack.c.bf16 %v1369_v47, %v1368_v28 }
 0x222   : > { %1756 = vst [vmem:[%s2647_s16 + $0x70] sm:$0xff] %v1736_v13  }
 0x223   : > { %1752 = vst [vmem:[%s2647_s16 + $0x50] sm:$0xff] %v1716_v12  }
 0x225   : > { %v1278_v26 = vpop.f32.mrf.mxu0 }
 0x226   : > { %v1279_v37 = vadd.f32 %v2637_v17, %v1278_v26 }
 0x227   : > { %v1298_v55 = vpop.f32.mrf.mxu1 }
 0x228   : > { %v1299_v10 = vadd.f32 %v2637_v17, %v1298_v55  ;;  %v1352_v11 = vmax.f32 %v1279_v37, 0.0 }
 0x22a   : > { %v1360_v29 = vmax.f32 %v1299_v10, 0.0 }
 0x22d   : > { %v1280_v35 = vpop.f32.mrf.mxu0 }
 0x22e   : > { %v1281_v48 = vadd.f32 %v2637_v17, %v1280_v35 }
 0x22f   : > { %v1300_v51 = vpop.f32.mrf.mxu1 }
 0x230   : > { %v1353_v54 = vmax.f32 %v1281_v48, 0.0  ;;  %v1301_v41 = vadd.f32 %v2637_v17, %v1300_v51 }
 0x232   : > { %v1676_v6 = vpack.c.bf16 %v1353_v54, %v1352_v11  ;;  %v1361_v22 = vmax.f32 %v1301_v41, 0.0 }
 0x234   : > { %1744 = vst [vmem:[%s2647_s16 + $0x10] sm:$0xff] %v1676_v6   ;;  %v1696_v7 = vpack.c.bf16 %v1361_v22, %v1360_v29 }
 0x236   : > { %1748 = vst [vmem:[%s2647_s16 + $0x30] sm:$0xff] %v1696_v7  }
 0x245   : > { %v1323_v25 = vpop.f32.mrf.mxu2 }
 0x246   : > { %v1324_v34 = vadd.f32 %v2637_v17, %v1323_v25 }
 0x248   : > { %v1370_v33 = vmax.f32 %v1324_v34, 0.0 }
 0x24c   : > { %v1343_v5 = vpop.f32.mrf.mxu3 }
 0x24d   : > { %v1325_v45 = vpop.f32.mrf.mxu2  ;;  %v1344_v58 = vadd.f32 %v2637_v17, %v1343_v5 }
 0x24e   : > { %v1326_v0 = vadd.f32 %v2637_v17, %v1325_v45 }
 0x24f   : > { %v1378_v61 = vmax.f32 %v1344_v58, 0.0 }
 0x250   : > { %v1371_v21 = vmax.f32 %v1326_v0, 0.0 }
 0x252   : > { %v1721_v16 = vpack.c.bf16 %v1371_v21, %v1370_v33 }
 0x254   : > { %1753 = vst [vmem:[%s2647_s16 + $0x58] sm:$0xff] %v1721_v16   ;;  %v1345_v44 = vpop.f32.mrf.mxu3 }
 0x255   : > { %v1346_v8 = vadd.f32 %v2637_v17, %v1345_v44 }
 0x257   : > { %v1379_v3 = vmax.f32 %v1346_v8, 0.0 }
 0x259   : > { %v1741_v63 = vpack.c.bf16 %v1379_v3, %v1378_v61 }
 0x25b   : > { %1757 = vst [vmem:[%s2647_s16 + $0x78] sm:$0xff] %v1741_v63  }
 0x25d   : > { %v1303_v42 = vpop.f32.mrf.mxu1 }
 0x25e   : > { %v1283_v52 = vpop.f32.mrf.mxu0  ;;  %v1304_v14 = vadd.f32 %v2637_v17, %v1303_v42 }
 0x25f   : > { %v1284_v31 = vadd.f32 %v2637_v17, %v1283_v52 }
 0x260   : > { %v1362_v59 = vmax.f32 %v1304_v14, 0.0 }
 0x261   : > { %v1354_v49 = vmax.f32 %v1284_v31, 0.0 }
 0x265   : > { %v1305_v18 = vpop.f32.mrf.mxu1 }
 0x266   : > { %v1285_v2 = vpop.f32.mrf.mxu0  ;;  %v1306_v56 = vadd.f32 %v2637_v17, %v1305_v18 }
 0x267   : > { %v1286_v19 = vadd.f32 %v2637_v17, %v1285_v2 }
 0x268   : > { %v1363_v23 = vmax.f32 %v1306_v56, 0.0 }
 0x269   : > { %v1355_v24 = vmax.f32 %v1286_v19, 0.0 }
 0x26a   : > { %v1701_v57 = vpack.c.bf16 %v1363_v23, %v1362_v59 }
 0x26b   : > { %v1681_v60 = vpack.c.bf16 %v1355_v24, %v1354_v49 }
 0x26c   : > { %1749 = vst [vmem:[%s2647_s16 + $0x38] sm:$0xff] %v1701_v57  }
 0x26d   : > { %1745 = vst [vmem:[%s2647_s16 + $0x18] sm:$0xff] %v1681_v60  }
 0x26e PF: > { %s13_s14 = sadd.s32 1, %s1824_s14   ;;  %s2746_s12 = smov %s1820_s13 }
 0x26f   : > { %p10_p5 = scmp.ge.s32.totalorder %s13_s14, 4   ;;  %s2747_s13 = smov %s2749_s15 }
 0x271   :  { %12 = sbr.rel (!%p10_p5) target bundleno = 2 (0x2), region = 62 }

</bundles_post_ra>
